<compile_context>
chip_gen: v7x
topology: tpu7x:2x2x1
jax: 0.10.0
libtpu: 0.0.40
codegen_flags: <defaults>
</compile_context>

<pallas_src>
import jax
import jax.numpy as jnp
from jax.experimental import pallas as pl
from jax.experimental.pallas import tpu as pltpu

LANE = 128


def _round_up(x, m):
    return (x + m - 1) // m * m


def _make_kernel(*, k_taps, cin, l_tile, stride, dilation, use_im2col, overlap):
    """Fused (depthwise-folded-into-pointwise) conv1d for one (batch, L-tile)."""
    win = l_tile + LANE

    def _copy(x_hbm, xbuf, sem, b, tile_idx, slot):
        start = pl.multiple_of(tile_idx * l_tile, LANE)
        return pltpu.make_async_copy(
            x_hbm.at[b, :, :, pl.ds(start, win)], xbuf.at[slot], sem.at[slot])

    def kernel(x_hbm, w_ref, bias_ref, o_ref, xbuf, sem, scr):
        # x_hbm    : (B, S, Cin, n_q) in HBM (phase-split, zero-padded input)
        # w_ref    : (Cout, K*Cin) if use_im2col else (K, Cout, Cin)
        # bias_ref : (Cout, 1) f32
        # o_ref    : (Cout, l_tile)
        # xbuf     : (nbuf, S, Cin, l_tile + 128) VMEM input-window scratch
        # sem      : (nbuf,) DMA semaphores
        # scr      : (K*Cin, l_tile) im2col scratch OR (Cout, l_tile) f32 acc
        b = pl.program_id(0)
        i = pl.program_id(1)

        if overlap:
            # Double-buffered input DMA: prime at the first tile of each batch
            # row, then prefetch tile i+1 while computing tile i.  Safe under
            # ("parallel", "arbitrary"): a megacore split can only happen along
            # the batch axis, so every core still starts each row at i == 0.
            slot = i % 2

            @pl.when(i == 0)
            def _():
                _copy(x_hbm, xbuf, sem, b, 0, 0).start()

            @pl.when(i + 1 < pl.num_programs(1))
            def _():
                _copy(x_hbm, xbuf, sem, b, i + 1, 1 - slot).start()

            _copy(x_hbm, xbuf, sem, b, i, slot).wait()
        else:
            # Per-step sync copy: no cross-step state, both grid axes parallel.
            slot = 0
            cp = _copy(x_hbm, xbuf, sem, b, i, slot)
            cp.start()
            cp.wait()

        xc = xbuf.at[slot]                       # (S, Cin, l_tile + 128)

        taps = [((kk * dilation) % stride, (kk * dilation) // stride)
                for kk in range(k_taps)]

        if use_im2col:
            # Pack the K shifted windows and contract once:
            # (Cout, K*Cin) @ (K*Cin, l_tile) — fills the MXU better than K
            # tiny-contraction matmuls when Cin is small, single drain.
            for kk, (p, q) in enumerate(taps):
                scr[kk * cin:(kk + 1) * cin, :] = xc[p, :, pl.ds(q, l_tile)]
            acc = jnp.dot(w_ref[...], scr[...],
                          preferred_element_type=jnp.float32)
        else:
            # K matmuls with contraction Cin, accumulated into an f32 VMEM
            # accumulator (in-place +=; MRB-friendly on v7x).
            scr[...] = jnp.zeros_like(scr)
            for kk, (p, q) in enumerate(taps):
                scr[...] += jnp.dot(w_ref[kk], xc[p, :, pl.ds(q, l_tile)],
                                    preferred_element_type=jnp.float32)
            acc = scr[...]

        o_ref[...] = (acc + bias_ref[...]).astype(o_ref.dtype)

    return kernel


def dwpw_conv1d(x, w_dw, w_pw, bias=None, *, stride=1, padding=0, dilation=1,
                decoupling_rank=1, l_tile=None, im2col=None, overlap_dma=None):
    """Forward pass of DWPW_Conv1d.

    x     : (B, Cin, L)
    w_dw  : (Cin*R, 1, K)    depthwise conv weight (groups=Cin, no bias)
    w_pw  : (Cout, Cin*R, 1) 1x1 pointwise conv weight
    bias  : (Cout,) or None
    returns (B, Cout, L_out)
    """
    B, Cin, L = x.shape
    CinR, _, K = w_dw.shape
    R = decoupling_rank
    assert CinR == Cin * R, (CinR, Cin, R)
    Cout = w_pw.shape[0]
    assert w_pw.shape == (Cout, Cin * R, 1)
    S = stride
    dtype = x.dtype
    isz = jnp.dtype(dtype).itemsize

    L_out = (L + 2 * padding - dilation * (K - 1) - 1) // S + 1
    assert L_out > 0

    if im2col is None:
        im2col = Cin < 64          # small contraction -> pack the K taps
    if overlap_dma is None:
        # B >= 2: double-buffer the input DMA (batch axis stays "parallel").
        # B == 1: per-step sync copies so both axes stay "parallel" for v7x.
        overlap_dma = B >= 2
    nbuf = 2 if overlap_dma else 1

    halo_q = (dilation * (K - 1)) // S
    assert halo_q <= LANE, "receptive field too large for the 128-wide halo"

    # ---- tile-size selection under an explicit VMEM budget ------------------
    def vmem_bytes(lt):
        xb = nbuf * S * Cin * (lt + LANE) * isz          # input-window scratch
        ob = 2 * Cout * lt * isz                         # out double-buffer
        sc = K * Cin * lt * isz if im2col else Cout * lt * 4
        wb = K * Cout * Cin * isz + Cout * 4
        return xb + ob + sc + wb + (64 << 10)

    VMEM_BUDGET = 20 << 20        # leave headroom vs v7x's 64 MiB physical VMEM
    if l_tile is None:
        l_tile = min(2048, _round_up(L_out, LANE))
        if B == 1 and L_out > LANE:
            # keep >= 2 length tiles so a 2nd TensorCore has work (v7x)
            l_tile = min(l_tile, _round_up(-(-L_out // 2), LANE))
        while l_tile > LANE and vmem_bytes(l_tile) > VMEM_BUDGET:
            l_tile = max(LANE, _round_up(l_tile // 2, LANE))
    assert l_tile % LANE == 0
    assert vmem_bytes(l_tile) <= (40 << 20), \
        "per-step VMEM footprint too large; reduce l_tile or channel counts"

    n_lt = pl.cdiv(L_out, l_tile)
    L_out_pad = n_lt * l_tile

    # ---- wrapper-side glue (XLA): pad, phase-split, fold weights ------------
    n_q = L_out_pad + LANE
    L_in_total = n_q * S
    pad_right = L_in_total - L - padding
    assert pad_right >= 0
    # TODO(synk): fold the zero padding / stride phase split into the kernel
    # (masked edge DMAs) to save this extra HBM pass over x.
    x_pad = jnp.pad(x, ((0, 0), (0, 0), (padding, pad_right)))
    # x_ph[b, p, c, j] == x_pad[b, c, j*S + p]  -> all in-kernel tap reads are
    # unit-stride slices of the DMA'd window (free reshape when S == 1).
    x_ph = x_pad.reshape(B, Cin, n_q, S).transpose(0, 3, 1, 2)   # (B, S, Cin, n_q)

    # Fold depthwise into pointwise: W_eff[k, co, c] = sum_r wpw[co,c,r]*wdw[c,r,k]
    wdw_crk = w_dw[:, 0, :].reshape(Cin, R, K).astype(jnp.float32)   # (c, r, k)
    wpw_ocr = w_pw[:, :, 0].reshape(Cout, Cin, R).astype(jnp.float32)  # (o, c, r)
    w_eff = jnp.einsum("ocr,crk->koc", wpw_ocr, wdw_crk)            # (K, Cout, Cin)
    if im2col:
        w_kern = w_eff.transpose(1, 0, 2).reshape(Cout, K * Cin).astype(dtype)
        w_spec = pl.BlockSpec((Cout, K * Cin), lambda b, i: (0, 0))
        scr_shape = pltpu.VMEM((K * Cin, l_tile), dtype)
    else:
        w_kern = w_eff.astype(dtype)
        w_spec = pl.BlockSpec((K, Cout, Cin), lambda b, i: (0, 0, 0))
        scr_shape = pltpu.VMEM((Cout, l_tile), jnp.float32)

    if bias is None:
        bias = jnp.zeros((Cout,), jnp.float32)
    bias2 = bias.reshape(Cout, 1).astype(jnp.float32)

    kernel = _make_kernel(k_taps=K, cin=Cin, l_tile=l_tile, stride=S,
                          dilation=dilation, use_im2col=im2col,
                          overlap=overlap_dma)

    cost = pl.CostEstimate(
        flops=2 * B * L_out_pad * Cout * Cin * K,
        transcendentals=0,
        bytes_accessed=int(x_ph.size * isz + w_kern.size * isz
                           + bias2.size * 4 + B * Cout * L_out_pad * isz))

    dims = ("parallel", "arbitrary") if overlap_dma else ("parallel", "parallel")

    out = pl.pallas_call(
        kernel,
        out_shape=jax.ShapeDtypeStruct((B, Cout, L_out_pad), dtype),
        grid=(B, n_lt),
        in_specs=[
            pl.BlockSpec(memory_space=pl.ANY),     # x stays in HBM; manual DMA
            w_spec,
            pl.BlockSpec((Cout, 1), lambda b, i: (0, 0)),
        ],
        out_specs=pl.BlockSpec((None, Cout, l_tile), lambda b, i: (b, 0, i)),
        scratch_shapes=[
            pltpu.VMEM((nbuf, S, Cin, l_tile + LANE), dtype),
            pltpu.SemaphoreType.DMA((nbuf,)),
            scr_shape,
        ],
        compiler_params=pltpu.CompilerParams(
            dimension_semantics=dims,
            vmem_limit_bytes=int(min(48 << 20,
                                     max(32 << 20, 2 * vmem_bytes(l_tile)))),
        ),
        cost_estimate=cost,
    )(x_ph, w_kern, bias2)

    if L_out_pad != L_out:
        out = out[:, :, :L_out]
    return out


def reference(x, w_dw, w_pw, bias, *, stride, padding, dilation):
    """Pure-JAX reference (lax conv) for verification."""
    dw = jax.lax.conv_general_dilated(
        x, w_dw, window_strides=(stride,), padding=[(padding, padding)],
        rhs_dilation=(dilation,), dimension_numbers=("NCH", "OIH", "NCH"),
        feature_group_count=x.shape[1])
    pw = jax.lax.conv_general_dilated(
        dw, w_pw, window_strides=(1,), padding=[(0, 0)],
        dimension_numbers=("NCH", "OIH", "NCH"))
    return pw + bias[None, :, None]


if __name__ == "__main__":
    key = jax.random.PRNGKey(0)

    # l_tile is kept small (128) in some configs purely to exercise the
    # multi-tile halo / prefetch paths at tiny test lengths; the production
    # default auto-selects up to 2048.
    # (B, Cin, Cout, L,   K, stride, padding, dilation, R, l_tile, im2col)
    configs = [
        (2, 4,  8,  16, 3, 1, 1, 1, 2, None, None),   # tiny, overlap DMA, im2col
        (1, 8, 16, 200, 3, 1, 1, 1, 2, None, None),   # B=1: sync DMA, both axes parallel
        (2, 4,  8, 300, 5, 2, 3, 3, 1, 128, None),    # stride>1 + dilation>1, halo, prefetch
        (2, 8,  8, 200, 3, 1, 1, 1, 1, 128, False),   # per-tap matmul + f32 acc path
    ]

    for idx, (B, Cin, Cout, L, K, s, p, d, R, lt, i2c) in enumerate(configs):
        key, kx, k1, k2, k3 = jax.random.split(key, 5)
        x = jax.random.normal(kx, (B, Cin, L), dtype=jnp.float32)

        bound_dw = 1.0 / (K ** 0.5)                 # fan_in = (Cin/groups)*K = K
        w_dw = jax.random.uniform(k1, (Cin * R, 1, K), jnp.float32, -bound_dw, bound_dw)
        bound_pw = 1.0 / ((Cin * R) ** 0.5)         # fan_in = Cin*R*1
        w_pw = jax.random.uniform(k2, (Cout, Cin * R, 1), jnp.float32, -bound_pw, bound_pw)
        bias = jax.random.uniform(k3, (Cout,), jnp.float32, -bound_pw, bound_pw)

        out = dwpw_conv1d(x, w_dw, w_pw, bias, stride=s, padding=p, dilation=d,
                          decoupling_rank=R, l_tile=lt, im2col=i2c)
        out = jax.block_until_ready(out)

        ref = reference(x, w_dw, w_pw, bias, stride=s, padding=p, dilation=d)
        assert out.shape == ref.shape, (idx, out.shape, ref.shape)
        err = float(jnp.max(jnp.abs(out - ref)))
        assert err < 1e-4, (idx, err)

    print("KERNEL_OK")
</pallas_src>

<mosaic_0001>
module attributes {stable_mosaic.version = 11 : i64} {
  func.func @kernel(%arg0: i32, %arg1: i32, %arg2: memref<2x1x4x256xf32, #tpu.memory_space<any>>, %arg3: memref<8x12xf32, #tpu.memory_space<vmem>>, %arg4: memref<8x1xf32, #tpu.memory_space<vmem>>, %arg5: memref<1x8x128xf32, #tpu.memory_space<vmem>>, %arg6: memref<2x1x4x256xf32, #tpu.memory_space<vmem>>, %arg7: memref<2x!tpu.dma_semaphore, #tpu.memory_space<semaphore_mem>>, %arg8: memref<12x128xf32, #tpu.memory_space<vmem>>) attributes {dimension_semantics = [#tpu.dimension_semantics<parallel>, #tpu.dimension_semantics<arbitrary>], iteration_bounds = array<i64: 2, 1>, scalar_prefetch = 0 : i64, scratch_operands = 3 : i64, tpu.core_type = #tpu.core_type<tc>, window_params = [{}, {pipeline_mode = #tpu.pipeline_mode<synchronous>, transform_indices = @transform_1, window_bounds = array<i64: 8, 12>}, {pipeline_mode = #tpu.pipeline_mode<synchronous>, transform_indices = @transform_2, window_bounds = array<i64: 8, 1>}, {transform_indices = @transform_3, window_bounds = array<i64: 1, 8, 128>}]} {
    %c2_i32 = arith.constant 2 : i32
    %c0_i32 = arith.constant 0 : i32
    %0 = arith.cmpi eq, %c2_i32, %c0_i32 : i32
    %c1_i32 = arith.constant 1 : i32
    %1 = arith.select %0, %c1_i32, %c2_i32 : i32
    %2 = arith.remsi %arg1, %1 : i32
    %c0_i32_0 = arith.constant 0 : i32
    %3 = arith.cmpi ne, %2, %c0_i32_0 : i32
    %c0_i32_1 = arith.constant 0 : i32
    %4 = arith.cmpi slt, %2, %c0_i32_1 : i32
    %c0_i32_2 = arith.constant 0 : i32
    %5 = arith.cmpi slt, %1, %c0_i32_2 : i32
    %6 = arith.xori %4, %5 : i1
    %7 = arith.andi %6, %3 : i1
    %8 = arith.addi %2, %1 : i32
    %9 = arith.select %7, %8, %2 : i32
    %c0_i32_3 = arith.constant 0 : i32
    %10 = arith.cmpi eq, %arg1, %c0_i32_3 : i32
    %11 = arith.extui %10 : i1 to i32
    %c0_i32_4 = arith.constant 0 : i32
    %12 = arith.cmpi ne, %11, %c0_i32_4 : i32
    scf.if %12 {
      %c0_i32_41 = arith.constant 0 : i32
      %49 = tpu.assume_multiple %c0_i32_41, 128 : i32
      %c0_i32_42 = arith.constant 0 : i32
      %c0_i32_43 = arith.constant 0 : i32
      %c0_i32_44 = arith.constant 0 : i32
      %c0_i32_45 = arith.constant 0 : i32
      %50 = tpu.memref_slice %arg2[%arg0, %c0_i32_44, %c0_i32_45, %49] : memref<2x1x4x256xf32, #tpu.memory_space<any>> -> memref<1x1x4x256xf32, #tpu.memory_space<any>>
      %51 = tpu.memref_squeeze %50 : memref<1x1x4x256xf32, #tpu.memory_space<any>> -> memref<1x4x256xf32, #tpu.memory_space<any>>
      %c0_i32_46 = arith.constant 0 : i32
      %c0_i32_47 = arith.constant 0 : i32
      %c0_i32_48 = arith.constant 0 : i32
      %52 = tpu.memref_slice %arg6[%c0_i32_42, %c0_i32_46, %c0_i32_47, %c0_i32_48] : memref<2x1x4x256xf32, #tpu.memory_space<vmem>> -> memref<1x1x4x256xf32, #tpu.memory_space<vmem>>
      %53 = tpu.memref_squeeze %52 : memref<1x1x4x256xf32, #tpu.memory_space<vmem>> -> memref<1x4x256xf32, #tpu.memory_space<vmem>>
      %54 = tpu.memref_slice %arg7[%c0_i32_43] : memref<2x!tpu.dma_semaphore, #tpu.memory_space<semaphore_mem>> -> memref<1x!tpu.dma_semaphore, #tpu.memory_space<semaphore_mem>>
      %55 = tpu.memref_squeeze %54 : memref<1x!tpu.dma_semaphore, #tpu.memory_space<semaphore_mem>> -> memref<!tpu.dma_semaphore, #tpu.memory_space<semaphore_mem>>
      tpu.enqueue_dma source(%51 : memref<1x4x256xf32, #tpu.memory_space<any>>) target(%53 : memref<1x4x256xf32, #tpu.memory_space<vmem>>) target_semaphore(%55 : memref<!tpu.dma_semaphore, #tpu.memory_space<semaphore_mem>>)
    } else {
    }
    %c1_i32_5 = arith.constant 1 : i32
    %13 = arith.addi %arg1, %c1_i32_5 : i32
    %c1_i32_6 = arith.constant 1 : i32
    %14 = arith.cmpi slt, %13, %c1_i32_6 : i32
    %15 = arith.extui %14 : i1 to i32
    %c0_i32_7 = arith.constant 0 : i32
    %16 = arith.cmpi ne, %15, %c0_i32_7 : i32
    scf.if %16 {
      %c1_i32_41 = arith.constant 1 : i32
      %49 = arith.addi %arg1, %c1_i32_41 : i32
      %c1_i32_42 = arith.constant 1 : i32
      %50 = arith.subi %c1_i32_42, %9 : i32
      %c128_i32_43 = arith.constant 128 : i32
      %51 = arith.muli %49, %c128_i32_43 : i32
      %52 = tpu.assume_multiple %51, 128 : i32
      %c0_i32_44 = arith.constant 0 : i32
      %c0_i32_45 = arith.constant 0 : i32
      %53 = tpu.memref_slice %arg2[%arg0, %c0_i32_44, %c0_i32_45, %52] : memref<2x1x4x256xf32, #tpu.memory_space<any>> -> memref<1x1x4x256xf32, #tpu.memory_space<any>>
      %54 = tpu.memref_squeeze %53 : memref<1x1x4x256xf32, #tpu.memory_space<any>> -> memref<1x4x256xf32, #tpu.memory_space<any>>
      %c0_i32_46 = arith.constant 0 : i32
      %c0_i32_47 = arith.constant 0 : i32
      %c0_i32_48 = arith.constant 0 : i32
      %55 = tpu.memref_slice %arg6[%50, %c0_i32_46, %c0_i32_47, %c0_i32_48] : memref<2x1x4x256xf32, #tpu.memory_space<vmem>> -> memref<1x1x4x256xf32, #tpu.memory_space<vmem>>
      %56 = tpu.memref_squeeze %55 : memref<1x1x4x256xf32, #tpu.memory_space<vmem>> -> memref<1x4x256xf32, #tpu.memory_space<vmem>>
      %57 = tpu.memref_slice %arg7[%50] : memref<2x!tpu.dma_semaphore, #tpu.memory_space<semaphore_mem>> -> memref<1x!tpu.dma_semaphore, #tpu.memory_space<semaphore_mem>>
      %58 = tpu.memref_squeeze %57 : memref<1x!tpu.dma_semaphore, #tpu.memory_space<semaphore_mem>> -> memref<!tpu.dma_semaphore, #tpu.memory_space<semaphore_mem>>
      tpu.enqueue_dma source(%54 : memref<1x4x256xf32, #tpu.memory_space<any>>) target(%56 : memref<1x4x256xf32, #tpu.memory_space<vmem>>) target_semaphore(%58 : memref<!tpu.dma_semaphore, #tpu.memory_space<semaphore_mem>>)
    } else {
    }
    %c128_i32 = arith.constant 128 : i32
    %17 = arith.muli %arg1, %c128_i32 : i32
    %18 = tpu.assume_multiple %17, 128 : i32
    %c0_i32_8 = arith.constant 0 : i32
    %c0_i32_9 = arith.constant 0 : i32
    %19 = tpu.memref_slice %arg2[%arg0, %c0_i32_8, %c0_i32_9, %18] : memref<2x1x4x256xf32, #tpu.memory_space<any>> -> memref<1x1x4x256xf32, #tpu.memory_space<any>>
    %20 = tpu.memref_squeeze %19 : memref<1x1x4x256xf32, #tpu.memory_space<any>> -> memref<1x4x256xf32, #tpu.memory_space<any>>
    %c0_i32_10 = arith.constant 0 : i32
    %c0_i32_11 = arith.constant 0 : i32
    %c0_i32_12 = arith.constant 0 : i32
    %21 = tpu.memref_slice %arg6[%9, %c0_i32_10, %c0_i32_11, %c0_i32_12] : memref<2x1x4x256xf32, #tpu.memory_space<vmem>> -> memref<1x1x4x256xf32, #tpu.memory_space<vmem>>
    %22 = tpu.memref_squeeze %21 : memref<1x1x4x256xf32, #tpu.memory_space<vmem>> -> memref<1x4x256xf32, #tpu.memory_space<vmem>>
    %23 = tpu.memref_slice %arg7[%9] : memref<2x!tpu.dma_semaphore, #tpu.memory_space<semaphore_mem>> -> memref<1x!tpu.dma_semaphore, #tpu.memory_space<semaphore_mem>>
    %24 = tpu.memref_squeeze %23 : memref<1x!tpu.dma_semaphore, #tpu.memory_space<semaphore_mem>> -> memref<!tpu.dma_semaphore, #tpu.memory_space<semaphore_mem>>
    tpu.wait_dma2 semaphore(%24 : memref<!tpu.dma_semaphore, #tpu.memory_space<semaphore_mem>>) src(%20 : memref<1x4x256xf32, #tpu.memory_space<any>>) dst(%22 : memref<1x4x256xf32, #tpu.memory_space<vmem>>)
    %c0_i32_13 = arith.constant 0 : i32
    %c0_i32_14 = arith.constant 0 : i32
    %c0_i32_15 = arith.constant 0 : i32
    %25 = tpu.memref_slice %arg6[%9, %c0_i32_13, %c0_i32_14, %c0_i32_15] : memref<2x1x4x256xf32, #tpu.memory_space<vmem>> -> memref<1x1x4x256xf32, #tpu.memory_space<vmem>>
    %26 = tpu.memref_squeeze %25 : memref<1x1x4x256xf32, #tpu.memory_space<vmem>> -> memref<1x4x256xf32, #tpu.memory_space<vmem>>
    %c0 = arith.constant 0 : index
    %c0_16 = arith.constant 0 : index
    %c0_17 = arith.constant 0 : index
    %27 = vector.load %26[%c0, %c0_16, %c0_17] : memref<1x4x256xf32, #tpu.memory_space<vmem>>, vector<1x4x128xf32>
    %28 = vector.shape_cast %27 : vector<1x4x128xf32> to vector<4x128xf32>
    %c0_18 = arith.constant 0 : index
    %c0_19 = arith.constant 0 : index
    %29 = vector.load %arg8[%c0_18, %c0_19] : memref<12x128xf32, #tpu.memory_space<vmem>>, vector<4x128xf32>
    tpu.vector_store %arg8[%c0_18, %c0_19], %28 {strides = array<i32>} : memref<12x128xf32, #tpu.memory_space<vmem>>, vector<4x128xf32>,
    %c0_i32_20 = arith.constant 0 : i32
    %c0_i32_21 = arith.constant 0 : i32
    %c0_i32_22 = arith.constant 0 : i32
    %30 = tpu.memref_slice %arg6[%9, %c0_i32_20, %c0_i32_21, %c0_i32_22] : memref<2x1x4x256xf32, #tpu.memory_space<vmem>> -> memref<1x1x4x256xf32, #tpu.memory_space<vmem>>
    %31 = tpu.memref_squeeze %30 : memref<1x1x4x256xf32, #tpu.memory_space<vmem>> -> memref<1x4x256xf32, #tpu.memory_space<vmem>>
    %c0_23 = arith.constant 0 : index
    %c0_24 = arith.constant 0 : index
    %c1 = arith.constant 1 : index
    %32 = vector.load %31[%c0_23, %c0_24, %c1] : memref<1x4x256xf32, #tpu.memory_space<vmem>>, vector<1x4x128xf32>
    %33 = vector.shape_cast %32 : vector<1x4x128xf32> to vector<4x128xf32>
    %c4 = arith.constant 4 : index
    %c0_25 = arith.constant 0 : index
    %34 = vector.load %arg8[%c4, %c0_25] : memref<12x128xf32, #tpu.memory_space<vmem>>, vector<4x128xf32>
    tpu.vector_store %arg8[%c4, %c0_25], %33 {strides = array<i32>} : memref<12x128xf32, #tpu.memory_space<vmem>>, vector<4x128xf32>,
    %c0_i32_26 = arith.constant 0 : i32
    %c0_i32_27 = arith.constant 0 : i32
    %c0_i32_28 = arith.constant 0 : i32
    %35 = tpu.memref_slice %arg6[%9, %c0_i32_26, %c0_i32_27, %c0_i32_28] : memref<2x1x4x256xf32, #tpu.memory_space<vmem>> -> memref<1x1x4x256xf32, #tpu.memory_space<vmem>>
    %36 = tpu.memref_squeeze %35 : memref<1x1x4x256xf32, #tpu.memory_space<vmem>> -> memref<1x4x256xf32, #tpu.memory_space<vmem>>
    %c0_29 = arith.constant 0 : index
    %c0_30 = arith.constant 0 : index
    %c2 = arith.constant 2 : index
    %37 = vector.load %36[%c0_29, %c0_30, %c2] : memref<1x4x256xf32, #tpu.memory_space<vmem>>, vector<1x4x128xf32>
    %38 = vector.shape_cast %37 : vector<1x4x128xf32> to vector<4x128xf32>
    %c8 = arith.constant 8 : index
    %c0_31 = arith.constant 0 : index
    %39 = vector.load %arg8[%c8, %c0_31] : memref<12x128xf32, #tpu.memory_space<vmem>>, vector<4x128xf32>
    tpu.vector_store %arg8[%c8, %c0_31], %38 {strides = array<i32>} : memref<12x128xf32, #tpu.memory_space<vmem>>, vector<4x128xf32>,
    %c0_32 = arith.constant 0 : index
    %c0_33 = arith.constant 0 : index
    %40 = vector.load %arg3[%c0_32, %c0_33] : memref<8x12xf32, #tpu.memory_space<vmem>>, vector<8x12xf32>
    %c0_34 = arith.constant 0 : index
    %c0_35 = arith.constant 0 : index
    %41 = vector.load %arg8[%c0_34, %c0_35] : memref<12x128xf32, #tpu.memory_space<vmem>>, vector<12x128xf32>
    %cst = arith.constant dense<0.000000e+00> : vector<8x128xf32>
    %42 = tpu.matmul %40, %41, %cst {dimension_numbers = #tpu.dot_dimension_numbers<[1], [0], [0], [1], [0, 0, 1, 1], [], []>} : vector<8x12xf32>, vector<12x128xf32>, vector<8x128xf32> -> vector<8x128xf32>
    %c0_36 = arith.constant 0 : index
    %c0_37 = arith.constant 0 : index
    %43 = vector.load %arg4[%c0_36, %c0_37] : memref<8x1xf32, #tpu.memory_space<vmem>>, vector<8x1xf32>
    %44 = vector.broadcast %43 : vector<8x1xf32> to vector<8x128xf32>
    %45 = arith.addf %42, %44 : vector<8x128xf32>
    %c0_38 = arith.constant 0 : index
    %c0_39 = arith.constant 0 : index
    %c0_40 = arith.constant 0 : index
    %46 = vector.load %arg5[%c0_38, %c0_39, %c0_40] : memref<1x8x128xf32, #tpu.memory_space<vmem>>, vector<1x8x128xf32>
    %47 = vector.shape_cast %46 : vector<1x8x128xf32> to vector<8x128xf32>
    %48 = vector.shape_cast %45 : vector<8x128xf32> to vector<1x8x128xf32>
    tpu.vector_store %arg5[%c0_38, %c0_39, %c0_40], %48 {strides = array<i32>} : memref<1x8x128xf32, #tpu.memory_space<vmem>>, vector<1x8x128xf32>,
    return
  }
  func.func @transform_1(%arg0: i32, %arg1: i32) -> (i32, i32) {
    %c0_i32 = arith.constant 0 : i32
    %c0_i32_0 = arith.constant 0 : i32
    %c0_i32_1 = arith.constant 0 : i32
    return %c0_i32, %c0_i32_0 : i32, i32
  }
  func.func @transform_2(%arg0: i32, %arg1: i32) -> (i32, i32) {
    %c0_i32 = arith.constant 0 : i32
    %c0_i32_0 = arith.constant 0 : i32
    %c0_i32_1 = arith.constant 0 : i32
    return %c0_i32, %c0_i32_0 : i32, i32
  }
  func.func @transform_3(%arg0: i32, %arg1: i32) -> (i32, i32, i32) {
    %c0_i32 = arith.constant 0 : i32
    %c0_i32_0 = arith.constant 0 : i32
    return %arg0, %c0_i32, %arg1 : i32, i32, i32
  }
}

</mosaic_0001>

<bundles_post_ra>
// kernel: tpu_custom_call.1
= control target key start
LH: loop header
LB: loop body
LE: loop exit
PB: predicated region body
PF: predicated region fallthrough
CT: control target
= control target key end

     0   :  { %8 = vsyncpa [#allocation6], 0  ;;  %s786_s0 = inlined_call_operand.hbm [shape: f32[2,1,4,256], index: 0, kind: input, shape index: {}]   ;;  %s787_s1 = inlined_call_operand.vmem [shape: f32[8,12], index: 1, kind: input, shape index: {}]   ;;  %s788_s2 = inlined_call_operand.vmem [shape: f32[8,1], index: 2, kind: input, shape index: {}]   ;;  %s789_s3 = inlined_call_operand.hbm [shape: f32[2,8,128], index: 3, kind: output, shape index: {}]  }
   0x1   :  { %10 = vsyncpa [#allocation6 + $0x1], 0  ;;  %s649_s12 = smov 0   ;;  %s651_s13 = smov 0  }
   0x2   :  { %s653_s14 = smov 0   ;;  %s655_s15 = smov 0  }
   0x3   :  { %s657_s16 = smov 0   ;;  %s659_s17 = smov 0  }
   0x4 LB: > { %s415_s18 = sadd.s32 4294967295, %s618_s17   ;;  %s416_s19 = sadd.s32 4294967294, %s618_s17   ;;  %s618_s17 = sphi %s659_s17, %s16_s17   ;;  %s614_s16 = sphi %s657_s16, %s796_s16   ;;  %s610_s15 = sphi %s655_s15, %s795_s15   ;;  %s606_s14 = sphi %s653_s14, %s794_s14   ;;  %s602_s13 = sphi %s651_s13, %s793_s13   ;;  %s598_s12 = sphi %s649_s12, %s792_s12  }
   0x5   : > { %s28_s20 = sadd.s32 1, %s614_s16  ;;  %s79_s21 = sadd.s32 1, %s606_s14 }
   0x6   : > { %p30_p0 = scmp.ge.s32.totalorder %s28_s20, 2  ;;  %p89_p1 = scmp.ne.s32.totalorder %s606_s14, %s602_s13 }
   0x7   : > { %p90_p2 = scmp.eq.s32.totalorder %s415_s18, 1  ;;  %p95_p3 = scmp.ne.s32.totalorder %s602_s13, %s598_s12 }
   0x8   : > { %s798_s20 = smov (%p30_p0, %s28_s20), 0  ;;  %p96_p5 = scmp.eq.s32.totalorder %s416_s19, 1 }
   0x9   : > { %p689_p4 = por %p90_p2, %p89_p1  ;;  %s74_s23 = ssub.s32 %s614_s16, %s798_s20 }
   0xa   : > { %p418_p6 = scmp.ge.s32.totalorder %s618_s17, 1  ;;  %p77_p7 = scmp.eq.s32.totalorder %s74_s23, 0 }
   0xb   : > { %p696_p8 = por %p96_p5, %p95_p3  ;;  %p120_p9 = scmp.lt.s32.totalorder %s618_s17, 3 }
   0xc   : > { %s702_s25 = scalar_select %p77_p7, %s606_s14, %s79_s21  }
   0xd   : > { %p121_p10 = pnand %p418_p6, %p120_p9 }
   0xe   : > { %s134_s26 = sand.u32 (!%p121_p10), 1, %s602_s13   ;;  %s432_s27 = sshll.u32 (!%p121_p10), %s610_s15, 7 }
   0xf   : > { %124 = sbr.rel (%p121_p10) target bundleno = 403 (0x193), region = 28  ;;  %s708_s28 = sshll.u32 (!%p121_p10), %s134_s26, 3 }
  0x10   : > { %s156_s4 = scalar_lea.hbm (!%p121_p10), %s786_s0, %s432_s27  ;;  %s620_s5 = smov (!%p121_p10), [#allocation2]  }
  0x11   : > { %s164_s6 = sshll.u32 (!%p121_p10), %s620_s5, 4  ;;  %s514_s7 = scalar_lea.hbm (!%p121_p10), %s156_s4, 128  ;;  %s165_s6 = int_to_ptr.vmem [resolvable:$true] %s164_s6 }
  0x12   : > { %p515_p11 = scmp.ne.s32.totalorder (!%p121_p10), %s156_s4, %s514_s7  ;;  %s516_s10 = scalar_lea.hbm (!%p121_p10), %s786_s0, 256 }
  0x13   : > { %p517_p12 = scmp.lt.u32.totalorder (!%p121_p10), %s156_s4, %s786_s0  ;;  %p518_p13 = scmp.lt.u32.totalorder (!%p121_p10), %s516_s10, %s514_s7 }
  0x14   : > { %p520_p1 = scmp.lt.u32.totalorder (!%p121_p10), %s514_s7, %s156_s4 }
  0x15   : > { %p519_p0 = por (!%p121_p10), %p518_p13, %p517_p12 }
  0x17   : > { %p521_p2 = por %p520_p1, %p519_p0 }
  0x19   : > { %p522_p3 = pnand %p521_p2, %p515_p11 }
  0x1b   : > { %525 = shalt.err (!%p522_p3)  }
  0x1c   : > { %s526_s19 = scalar_lea.vmem %s165_s6, 128  ;;  %s530_s21 = scalar_lea.vmem %s165_s6, 256 }
  0x1d   : > { %p527_p5 = scmp.ne.s32.totalorder %s165_s6, %s526_s19  ;;  %p531_p6 = scmp.lt.s32.totalorder %s165_s6, %s165_s6 }
  0x1e   : > { %p532_p7 = scmp.lt.s32.totalorder %s530_s21, %s526_s19 }
  0x20   : > { %p533_p9 = por %p532_p7, %p531_p6 }
  0x22   : > { %p534_p10 = pnand %p533_p9, %p527_p5 }
  0x24   : > { %537 = shalt.err (!%p534_p10)  }
  0x25   : > { %167 = dma.hbm_to_vmem [thread:$0]  %s156_s4, 128, %s165_s6, [#allocation3] }
  0x26   : > { %s136_s23 = scalar_lea.vmem [#allocation5], %s708_s28 }
  0x27   : > { %590 = dma.done.wait [#allocation3], 128 }
  0x28   : > { %591 = vsyncadd [#allocation3], 4294967168  ;;  %v621_v0 = vmov 0.0|0.0   ;;  %v206_v1 = vld [vmem:[#allocation2] sm:$0xf]  ;;  %s622_s29 = smov 126   ;;  %s735_s11 = scalar_lea.hbm %s789_s3, %s432_s27 }
  0x29   : > { %445 = vmatprep.subr.bf16.mxu0 %v621_v0  ;;  %v219_v2 = vld [vmem:[#allocation2] sm:$0xff]  ;;  %207 = vst [vmem:[#allocation4] sm:$0xf] %v206_v1  ;;  %s623_s30 = smov 127   ;;  %vm624_vm0 = vmmov 0   ;;  %v625_v4 = vmov 0.0  }
  0x2a   : > { %222 = vrot.lane.b32.xlu1 %v219_v2, %s622_s29  ;;  %v221_v3 = vcombine.high %v219_v2, %v219_v2  ;;  %211 = vrot.lane.b32.xlu0 %v219_v2, %s623_s30  ;;  %v233_v5 = vld [vmem:[%s788_s2] sm:$0xff]  ;;  %v626_v6 = vmov 0   ;;  %vm226_vm1 = vcmask 1031168   ;;  %vm215_vm2 = vcmask 1039360   ;;  %s333_s8 = sshll.u32 %s136_s23, 4  ;;  %s319_s18 = scalar_lea.sflag [#allocation6], %s134_s26  ;;  %s737_s8 = int_to_ptr.vmem [resolvable:$true] %s333_s8 }
  0x2b   : > { %442 = vmatprep.mubr.msk.f32.mxu0 %vm624_vm0, %v625_v4  ;;  %512 = vset.pattern.permute.xlu0 %v626_v6  ;;  %vm243_vm3 = vcmask 1043456   ;;  %vm627_vm4 = vmmov 1   ;;  %v230_v16 = vld [vmem:[%s787_s1] sm:$0xff]  ;;  %vm239_vm6 = vcmask 97280   ;;  %s538_s19 = scalar_lea.vmem %s737_s8, 128  ;;  %s628_s15 = smov [#allocation5]  }
  0x2c   : > { %vm447_vm5 = vmpackc.low %vm243_vm3, %vm627_vm4  ;;  %p539_p11 = scmp.ne.s32.totalorder %s737_s8, %s538_s19  ;;  %s542_s21 = sshll.u32 %s628_s15, 4  ;;  %s543_s21 = int_to_ptr.vmem [resolvable:$false] %s542_s21 }
  0x2d   : > { %p545_p0 = scmp.lt.s32.totalorder %s737_s8, %s543_s21 }
  0x2e   : > { %224 = vrot.lane.b32.xlu1 %v221_v3, %s622_s29  ;;  %213 = vrot.lane.b32.xlu0 %v221_v3, %s623_s30  ;;  %p540_p12 = pnand %p539_p11, %p689_p4  ;;  %s544_s29 = scalar_lea.vmem %s543_s21, 256 }
  0x2f   : > { %p546_p1 = scmp.lt.s32.totalorder %s544_s29, %s538_s19 }
  0x30   : > { %p541_p13 = pneg %p540_p12 }
  0x31   : > { %p547_p2 = por %p546_p1, %p545_p0 }
  0x32   : > { %236 = vperm.xlu0 %512, %v233_v5  }
  0x33   : > { %p548_p3 = pnand %p547_p2, %p541_p13 }
  0x9c   : > { %v223_v7 = vpop.permute.xlu1 %222  ;;  %v212_v8 = vpop.permute.xlu0 %211 }
  0xa0   : > { %v225_v9 = vpop.permute.xlu1 %224  ;;  %v214_v10 = vpop.permute.xlu0 %213 }
  0xa1   : > { %v227_v11 = vsel %vm226_vm1, %v223_v7, %v225_v9  ;;  %v216_v12 = vsel %vm215_vm2, %v212_v8, %v214_v10 }
  0xa2   : > { %229 = vst [vmem:[#allocation4 + $0x8] sm:$0xf] %v227_v11  ;;  %218 = vst [vmem:[#allocation4 + $0x4] sm:$0xf] %v216_v12 }
  0xa9   : > { %v231_v13 = vld [vmem:[#allocation4] sm:$0xff]  ;;  %v232_v14 = vld [vmem:[#allocation4 + $0x8] sm:$0xf] }
  0xaa   : > { %v446_v15 = vpack.c.bf16 %v232_v14, %v231_v13 }
  0xac   : > { %448 = vmatpush3.bf16.msk.msra.mxu0 %vm447_vm5, %v446_v15 }
  0xaf   : > { %443 = vmatmul.mubr.msk.f32.vlgmr.msra.gmra.mrb[0].mxu0 %vm239_vm6, %v230_v16 }
  0xb1   : > { %v237_v17 = vpop.permute.xlu0 %236 }
 0x182   : > { %v313_v18 = vpop.f32.mrb[0].mxu0 }
 0x183   : > { %v314_v19 = vadd.f32 %v313_v18, %v237_v17  ;;  %v444_v20 = vpop.f32.mrb[1].mxu0 }
 0x185   : > { %317 = vst [vmem:[%s136_s23] sm:$0xff] %v314_v19 }
 0x186   : > { %551 = shalt.err (!%p548_p3)
}
 0x187   : > { %s552_s26 = scalar_lea.hbm %s735_s11, 128  ;;  %s556_s23 = scalar_lea.hbm %s789_s3, 256 }
 0x188   : > { %p553_p5 = scmp.ne.s32.totalorder %s735_s11, %s552_s26  ;;  %p557_p9 = scmp.lt.u32.totalorder %s735_s11, %s789_s3 }
 0x189   : > { %p558_p10 = scmp.lt.u32.totalorder %s556_s23, %s552_s26  ;;  %p560_p12 = scmp.lt.u32.totalorder %s552_s26, %s735_s11 }
 0x18a   : > { %p554_p6 = pnand %p553_p5, %p689_p4 }
 0x18b   : > { %p559_p11 = por %p558_p10, %p557_p9 }
 0x18c   : > { %p555_p7 = pneg %p554_p6 }
 0x18d   : > { %p561_p13 = por %p560_p12, %p559_p11 }
 0x18f   : > { %p562_p0 = pnand %p561_p13, %p555_p7 }
 0x191   : > { %565 = shalt.err (!%p562_p0)
}
 0x192   : > { %449 = dma.vmem_to_hbm [thread:$0]  (%p689_p4), %s737_s8, 128, %s735_s11, %s319_s18  }
 0x193 PF: > { %p455_p1 = scmp.ge.s32.totalorder %s618_s17, 2  ;;  %s345_s5 = sand.u32 1, %s598_s12  }
 0x194   : > { %s346_s6 = scalar_lea.sflag [#allocation6], %s345_s5 }
 0x195   : > { %p452_p2 = pnand %p455_p1, %p696_p8 }
 0x197   : > { %593 = dma.done.wait (!%p452_p2), %s346_s6, 128  }
 0x198   : > { %595 = vsyncadd (!%p452_p2), %s346_s6, 4294967168  ;;  %s16_s17 = sadd.s32 1, %s618_s17   ;;  %s792_s12 = smov %s602_s13 }
 0x199   : > { %p13_p3 = scmp.ge.s32.totalorder %s16_s17, 4   ;;  %s793_s13 = smov %s606_s14 }
 0x19a   : > { %s794_s14 = smov %s702_s25  ;;  %s795_s15 = smov %s614_s16 }
 0x19b   : > { %s796_s16 = smov %s798_s20  ;;  %15 = sbr.rel (!%p13_p3) target bundleno = 4 (0x4), region = 83 }
 0x1a2   :  { %351 = vsyncpa [#allocation6], 1 }
 0x1a3   :  { %353 = vsyncpa [#allocation6 + $0x1], 1 }
 0x1a4   :  { %354 = vsyncmov [#allocation3] }
 0x1a7   :  { %s355_s22 = vpop.sfrf %354 }
 0x1a8   :  { %p430_p4 = scmp.ne.s32.totalorder %s355_s22, 0 }
 0x1aa   :  { %359 = shalt.err (%p430_p4)  }
 0x1ab   :  { %361 = vsyncmov [#allocation3 + $0x1] }
 0x1ae   :  { %s362_s24 = vpop.sfrf %361 }
 0x1af   :  { %p431_p8 = scmp.ne.s32.totalorder %s362_s24, 0 }
 0x1b1   :  { %366 = shalt.err (%p431_p8)  }

</bundles_post_ra>
